<compile_context>
chip_gen: v7x
topology: tpu7x:2x2x1
jax: 0.10.0
libtpu: 0.0.40
codegen_flags: <defaults>
</compile_context>

<pallas_src>
import jax
import jax.numpy as jnp
from jax.experimental import pallas as pl
from jax.experimental.pallas import tpu as pltpu


TARGET_BLOCK_BYTES = 4 * 1024 * 1024    # ~4 MiB per block (85%-of-roofline regime)
VMEM_LIMIT_BYTES = 40 * 1024 * 1024     # explicit scoped-VMEM limit (v5e default is 16 MiB)
CLIP_LO = -1.0 + 0.01
CLIP_HI = 1.0


# ----------------------------- kernels --------------------------------------


def _classify_gamma(g: float) -> str:
    if g == 1.0:
        return "linear"
    if g == 2.0:
        return "square"
    if g == 0.5:
        return "sqrt"
    return "pow"


def _make_const_kernel(mode: str, gamma: float, offset: float, gain: float):
    """Kernel with all parameters baked in as compile-time constants."""
    gamma = float(gamma)
    offset = float(offset)
    gain = float(gain)
    c1 = 2.0 * offset - 1.0      # folded (x - 0.5) * 2 + offset term
    c2 = 2.0 * gain

    def kernel(x_ref, o_ref):
        x = x_ref[...].astype(jnp.float32)
        xc = jnp.clip(x, CLIP_LO, CLIP_HI)
        if mode == "linear":
            # gamma == 1: out = gain * xc + (2*offset - 1 + gain)   (2 VALU ops)
            out = gain * xc + (c1 + gain)
        elif mode == "square":
            # gamma == 2: out = 0.5*gain*(1+xc)^2 + c1   (VPU only, no EUP)
            t = 1.0 + xc
            out = (0.5 * gain) * (t * t) + c1
        elif mode == "sqrt":
            # gamma == 0.5: 1 transcendental instead of 2
            y = (1.0 + xc) * 0.5
            out = c2 * jnp.sqrt(y) + c1
        else:
            # generic concrete gamma: exp/log pow on the EUP
            y = (1.0 + xc) * 0.5
            out = c2 * jnp.power(y, gamma) + c1
        o_ref[...] = out.astype(o_ref.dtype)

    return kernel


def _smem_kernel(params_ref, x_ref, o_ref):
    """Generic kernel for traced parameters. params = [gamma, c1, c2] in SMEM."""
    gamma = params_ref[0]
    c1 = params_ref[1]
    c2 = params_ref[2]
    x = x_ref[...].astype(jnp.float32)
    xc = jnp.clip(x, CLIP_LO, CLIP_HI)
    y = (1.0 + xc) * 0.5
    o_ref[...] = (c2 * jnp.power(y, gamma) + c1).astype(o_ref.dtype)


# ----------------------------- wrapper ---------------------------------------


def _pick_cols(n: int):
    """Widest lane-dense (multiple of 128) column count that divides n."""
    for c in (2048, 1024, 512, 256, 128):
        if n % c == 0:
            return c
    return None


def _camera_response_2d(x2d, kernel, params, transcendentals_per_elem):
    """Run the elementwise kernel over a lane-dense (rows, cols) slab."""
    rows, cols = x2d.shape
    dtype = x2d.dtype
    itemsize = jnp.dtype(dtype).itemsize

    # Byte-budget block sizing (multiple of 8 rows).
    budget_rows = max(8, (TARGET_BLOCK_BYTES // (cols * itemsize)) // 8 * 8)
    row_block = min(rows, budget_rows)
    # v7x: guarantee >= 2 grid steps so "parallel" shards across both TensorCores.
    if rows >= 16:
        half = max(8, (rows // 2) // 8 * 8)
        row_block = min(row_block, half)
    grid = (pl.cdiv(rows, row_block),)

    n = rows * cols
    cost = pl.CostEstimate(
        flops=5 * n,
        transcendentals=transcendentals_per_elem * n,
        bytes_accessed=2 * itemsize * n,
    )

    x_spec = pl.BlockSpec((row_block, cols), lambda i: (i, 0))
    o_spec = pl.BlockSpec((row_block, cols), lambda i: (i, 0))

    if params is None:
        in_specs = [x_spec]
        args = (x2d,)
    else:
        in_specs = [pl.BlockSpec(memory_space=pltpu.SMEM), x_spec]
        args = (params, x2d)

    return pl.pallas_call(
        kernel,
        out_shape=jax.ShapeDtypeStruct((rows, cols), dtype),
        grid_spec=pltpu.PrefetchScalarGridSpec(
            num_scalar_prefetch=0,
            grid=grid,
            in_specs=in_specs,
            out_specs=o_spec,
        ),
        compiler_params=pltpu.CompilerParams(
            dimension_semantics=("parallel",),
            vmem_limit_bytes=VMEM_LIMIT_BYTES,
        ),
        cost_estimate=cost,
    )(*args)


def _jnp_elementwise(x_flat, gamma, offset, gain, out_dtype):
    """Plain fused-jnp path for the tiny non-128-divisible tail."""
    x = x_flat.astype(jnp.float32)
    xc = jnp.clip(x, CLIP_LO, CLIP_HI)
    y = (1.0 + xc) * 0.5
    out = (offset + gain * jnp.power(y, gamma) - 0.5) * 2.0
    return out.astype(out_dtype)


def camera_response(x, gamma, offset, gain):
    """Elementwise camera response curve. x: any shape / float dtype."""
    orig_shape = x.shape
    orig_dtype = x.dtype
    n = x.size
    flat = x.reshape(-1)

    # Static specialization when all parameters are concrete (non-traced).
    try:
        g_c, o_c, gn_c = float(gamma), float(offset), float(gain)
        concrete = True
    except Exception:  # traced under jit -> generic SMEM-params pow kernel
        concrete = False

    if concrete:
        mode = _classify_gamma(g_c)
        kernel = _make_const_kernel(mode, g_c, o_c, gn_c)
        params = None
        transc = {"linear": 0, "square": 0, "sqrt": 1, "pow": 2}[mode]
    else:
        kernel = _smem_kernel
        gamma_f = jnp.asarray(gamma, jnp.float32).reshape(())
        c1 = 2.0 * jnp.asarray(offset, jnp.float32).reshape(()) - 1.0
        c2 = 2.0 * jnp.asarray(gain, jnp.float32).reshape(())
        params = jnp.stack([gamma_f, c1, c2])
        transc = 2

    def run2d(bulk_flat):
        m = bulk_flat.size
        cols = _pick_cols(m)
        rows = m // cols
        out2d = _camera_response_2d(
            bulk_flat.reshape(rows, cols), kernel, params, transc)
        return out2d.reshape(-1)

    if n % 128 == 0:
        # Common case: no padding, no extra HBM passes.
        return run2d(flat).reshape(orig_shape)

    # Rare fallback: bulk prefix via Pallas, (<128-element) tail via jnp.
    bulk = (n // 128) * 128
    tail = _jnp_elementwise(flat[bulk:], gamma, offset, gain, orig_dtype)
    if bulk == 0:
        return tail.reshape(orig_shape)
    out_bulk = run2d(flat[:bulk])
    return jnp.concatenate([out_bulk, tail]).reshape(orig_shape)


def camera_response_ref(x, gamma, offset, gain):
    """Pure-JAX reference matching the PyTorch forward."""
    x = jnp.clip(x, -1.0 + 0.01, 1.0)
    x = (1.0 + x) * 0.5
    x = offset + gain * jnp.power(x, gamma)
    return (x - 0.5) * 2.0


if __name__ == "__main__":
    key = jax.random.PRNGKey(0)
    # NCHW input, values roughly in [-2, 2] to exercise the clamp.
    x = jax.random.uniform(key, (2, 4, 16, 16), dtype=jnp.float32,
                           minval=-2.0, maxval=2.0)

    checks = []

    # 1) Default nn.Parameter init (gamma=1, offset=0, gain=1): baked linear path.
    out1 = jax.block_until_ready(camera_response(x, 1.0, 0.0, 1.0))
    checks.append((out1, camera_response_ref(x, 1.0, 0.0, 1.0), x.shape, x.dtype))

    # 2) Generic concrete gamma: baked pow (EUP) path.
    out2 = jax.block_until_ready(camera_response(x, 2.2, 0.05, 0.9))
    checks.append((out2, camera_response_ref(x, 2.2, 0.05, 0.9), x.shape, x.dtype))

    # 3) Rational-gamma specializations: square and sqrt (no exp/log pow).
    out3 = jax.block_until_ready(camera_response(x, 2.0, -0.01, 1.05))
    checks.append((out3, camera_response_ref(x, 2.0, -0.01, 1.05), x.shape, x.dtype))
    out4 = jax.block_until_ready(camera_response(x, 0.5, 0.02, 0.95))
    checks.append((out4, camera_response_ref(x, 0.5, 0.02, 0.95), x.shape, x.dtype))

    # 4) Traced parameters under jit: generic SMEM-params kernel.
    jit_cr = jax.jit(camera_response)
    g, o, gn = jnp.float32(1.3), jnp.float32(0.02), jnp.float32(1.1)
    out5 = jax.block_until_ready(jit_cr(x, g, o, gn))
    checks.append((out5, camera_response_ref(x, g, o, gn), x.shape, x.dtype))

    # 5) Non-128-divisible size: Pallas bulk prefix + jnp tail.
    x_odd = jax.random.uniform(jax.random.PRNGKey(1), (2, 3, 67),
                               dtype=jnp.float32, minval=-2.0, maxval=2.0)
    out6 = jax.block_until_ready(camera_response(x_odd, 2.2, 0.05, 0.9))
    checks.append((out6, camera_response_ref(x_odd, 2.2, 0.05, 0.9),
                   x_odd.shape, x_odd.dtype))

    for got, ref, shp, dt in checks:
        assert got.shape == shp and got.dtype == dt, "shape/dtype mismatch"
        assert jnp.allclose(got, ref, atol=2e-5, rtol=2e-5), "value mismatch"

    print("KERNEL_OK")
</pallas_src>

<mosaic_0001>
module attributes {stable_mosaic.version = 11 : i64} {
  func.func @kernel(%arg0: i32, %arg1: memref<1x2048xf32, #tpu.memory_space<vmem>>, %arg2: memref<1x2048xf32, #tpu.memory_space<vmem>>) attributes {dimension_semantics = [#tpu.dimension_semantics<parallel>], iteration_bounds = array<i64: 1>, scalar_prefetch = 0 : i64, scratch_operands = 0 : i64, tpu.core_type = #tpu.core_type<tc>, window_params = [{transform_indices = @transform_0, window_bounds = array<i64: 1, 2048>}, {transform_indices = @transform_1, window_bounds = array<i64: 1, 2048>}]} {
    %c0 = arith.constant 0 : index
    %c0_0 = arith.constant 0 : index
    %0 = vector.load %arg1[%c0, %c0_0] : memref<1x2048xf32, #tpu.memory_space<vmem>>, vector<1x2048xf32>
    %cst = arith.constant -9.900000e-01 : f32
    %cst_1 = arith.constant 1.000000e+00 : f32
    %1 = vector.broadcast %cst : f32 to vector<1x2048xf32>
    %2 = arith.maximumf %1, %0 : vector<1x2048xf32>
    %3 = vector.broadcast %cst_1 : f32 to vector<1x2048xf32>
    %4 = arith.minimumf %3, %2 : vector<1x2048xf32>
    %cst_2 = arith.constant 1.000000e+00 : f32
    %5 = vector.broadcast %cst_2 : f32 to vector<1x2048xf32>
    %6 = arith.mulf %5, %4 : vector<1x2048xf32>
    %cst_3 = arith.constant 0.000000e+00 : f32
    %7 = vector.broadcast %cst_3 : f32 to vector<1x2048xf32>
    %8 = arith.addf %6, %7 : vector<1x2048xf32>
    %c0_4 = arith.constant 0 : index
    %c0_5 = arith.constant 0 : index
    %9 = vector.load %arg2[%c0_4, %c0_5] : memref<1x2048xf32, #tpu.memory_space<vmem>>, vector<1x2048xf32>
    tpu.vector_store %arg2[%c0_4, %c0_5], %8 {strides = array<i32>} : memref<1x2048xf32, #tpu.memory_space<vmem>>, vector<1x2048xf32>,
    return
  }
  func.func @transform_0(%arg0: i32) -> (i32, i32) {
    %c0_i32 = arith.constant 0 : i32
    %c0_i32_0 = arith.constant 0 : i32
    return %arg0, %c0_i32 : i32, i32
  }
  func.func @transform_1(%arg0: i32) -> (i32, i32) {
    %c0_i32 = arith.constant 0 : i32
    %c0_i32_0 = arith.constant 0 : i32
    return %arg0, %c0_i32 : i32, i32
  }
}

</mosaic_0001>

<bundles_post_ra>
// kernel: tpu_custom_call.1
= control target key start
LH: loop header
LB: loop body
LE: loop exit
PB: predicated region body
PF: predicated region fallthrough
CT: control target
= control target key end

     0   :  { %6 = vsyncpa [#allocation3], 0  ;;  %s132_s0 = inlined_call_operand.hbm [shape: f32[1,2048], index: 0, kind: input, shape index: {}]   ;;  %s133_s1 = inlined_call_operand.hbm [shape: f32[1,2048], index: 1, kind: output, shape index: {}]  }
   0x1   :  { %7 = vsyncpa [#allocation4], 0  ;;  %s96_s6 = smov [#allocation2]   ;;  %s48_s10 = scalar_lea.hbm %s132_s0, 256 }
   0x2   :  { %s14_s7 = sshll.u32 %s96_s6, 4  ;;  %p49_p0 = scmp.ne.s32.totalorder %s132_s0, %s48_s10  ;;  %s15_s7 = int_to_ptr.vmem [resolvable:$true] %s14_s7 }
   0x3   :  { %p52_p1 = scmp.lt.u32.totalorder %s48_s10, %s132_s0 }
   0x5   :  { %p54_p2 = pnand %p52_p1, %p49_p0 }
   0x7   :  { %57 = shalt.err (!%p54_p2)
}
   0x8   :  { %s58_s15 = scalar_lea.vmem %s15_s7, 256  ;;  %p63_p4 = scmp.lt.s32.totalorder %s15_s7, %s15_s7 }
   0x9   :  { %p59_p3 = scmp.ne.s32.totalorder %s15_s7, %s58_s15  ;;  %p64_p5 = scmp.lt.s32.totalorder %s58_s15, %s58_s15 }
   0xb   :  { %p65_p6 = por %p64_p5, %p63_p4 }
   0xd   :  { %p66_p7 = pnand %p65_p6, %p59_p3 }
   0xf   :  { %69 = shalt.err (!%p66_p7)
}
  0x10   :  { %17 = dma.hbm_to_vmem [thread:$0]  %s132_s0, 256, %s15_s7, [#allocation3]  }
  0x11   :  { %92 = dma.done.wait [#allocation3], 256  }
  0x12   :  { %93 = vsyncadd [#allocation3], 4294967040  ;;  %v21_v0 = vld [vmem:[#allocation2] sm:$0xff]  ;;  %v22_v1 = vld [vmem:[#allocation2 + $0x8] sm:$0xff]  ;;  %s97_s18 = smov [#allocation5]  }
  0x13   :  { %s37_s19 = sshll.u32 %s97_s18, 4  ;;  %v23_v2 = vmax.f32 %v21_v0, -0.99  ;;  %v24_v3 = vmax.f32 %v22_v1, -0.99  ;;  %s38_s19 = int_to_ptr.vmem [resolvable:$true] %s37_s19 }
  0x14   :  { %s70_s20 = scalar_lea.vmem %s38_s19, 256  ;;  %p75_p9 = scmp.lt.s32.totalorder %s38_s19, %s38_s19 }
  0x15   :  { %v25_v4 = vmin.f32 %v23_v2, 1.0  ;;  %v26_v5 = vmin.f32 %v24_v3, 1.0  ;;  %p71_p8 = scmp.ne.s32.totalorder %s38_s19, %s70_s20  ;;  %p76_p10 = scmp.lt.s32.totalorder %s70_s20, %s70_s20 }
  0x17   :  { %29 = vst [vmem:[#allocation5] sm:$0xff] %v25_v4  ;;  %30 = vst [vmem:[#allocation5 + $0x8] sm:$0xff] %v26_v5  ;;  %p77_p11 = por %p76_p10, %p75_p9 }
  0x19   :  { %p78_p12 = pnand %p77_p11, %p71_p8 }
  0x1b   :  { %81 = shalt.err (!%p78_p12)
}
  0x1c   :  { %s82_s22 = scalar_lea.hbm %s133_s1, 256 }
  0x1d   :  { %p83_p13 = scmp.ne.s32.totalorder %s133_s1, %s82_s22  ;;  %p86_p0 = scmp.lt.u32.totalorder %s82_s22, %s133_s1 }
  0x1f   :  { %p88_p1 = pnand %p86_p0, %p83_p13 }
  0x21   :  { %91 = shalt.err (!%p88_p1)
}
  0x22   :  { %40 = dma.vmem_to_hbm [thread:$0]  %s38_s19, 256, %s133_s1, [#allocation4]  }
  0x23   :  { %94 = dma.done.wait [#allocation4], 256  }
  0x24   :  { %95 = vsyncadd [#allocation4], 4294967040 }
  0x25   :  { %44 = vsyncpa [#allocation3], 1 }
  0x26   :  { %45 = vsyncpa [#allocation4], 1 }

</bundles_post_ra>
